<compile_context>
chip_gen: v6e
topology: v6e:2x2x1
jax: 0.10.0
libtpu: 0.0.40
codegen_flags: <defaults>
</compile_context>

<pallas_src>
import jax
import jax.numpy as jnp
from jax.experimental import pallas as pl
from jax.experimental.pallas import tpu as pltpu

D_IN = 784                       # 28 * 28 (full-array block, no padding needed)
H1, H2, N_OUT = 300, 100, 10     # logical (torch) feature dims
H1_PAD, H2_PAD, OUT_PAD = 384, 128, 128   # lane-padded (multiples of 128)


def _round_up(n, m):
    return ((n + m - 1) // m) * m


def lenet_kernel(x_ref, w1_ref, b1_ref, w2_ref, b2_ref, w3_ref, b3_ref, o_ref):
    """One batch tile: fc1 -> ReLU -> fc2 -> ReLU -> fc3.

    x_ref: (TB, 784) bf16.  Weights are bf16, zero-padded to lane multiples;
    biases are f32.  All matmuls accumulate in f32 on the MXU; elementwise
    bias-add + ReLU stays in f32 (works on v5e's f32-only VPU)."""
    x = x_ref[...]                                               # bf16 (TB, 784)

    h1 = jnp.dot(x, w1_ref[...], preferred_element_type=jnp.float32)
    h1 = jnp.maximum(h1 + b1_ref[...], 0.0)                      # f32 (TB, 384)

    h2 = jnp.dot(h1.astype(jnp.bfloat16), w2_ref[...],
                 preferred_element_type=jnp.float32)
    h2 = jnp.maximum(h2 + b2_ref[...], 0.0)                      # f32 (TB, 128)

    h3 = jnp.dot(h2.astype(jnp.bfloat16), w3_ref[...],
                 preferred_element_type=jnp.float32)
    o_ref[...] = (h3 + b3_ref[...]).astype(o_ref.dtype)          # f32 (TB, 128)


def lenet_forward(x, params, *, block_b=256):
    """x: (B, 1, 28, 28) or (B, 784) float32.  Returns (B, 10) float32 logits."""
    w1, b1, w2, b2, w3, b3 = params
    xb = x.reshape(-1, D_IN)                                     # == view(-1, 784)
    b = xb.shape[0]

    # Batch tile: cap at block_b, keep the sublane dim a multiple of 8.
    tb = min(block_b, _round_up(b, 8))
    b_pad = _round_up(b, tb)
    if b_pad != b:
        xb = jnp.pad(xb, ((0, b_pad - b), (0, 0)))

    # bf16 inputs for the MXU; accumulation stays f32 inside the kernel.
    xb = xb.astype(jnp.bfloat16)
    w1b = w1.astype(jnp.bfloat16)
    w2b = w2.astype(jnp.bfloat16)
    w3b = w3.astype(jnp.bfloat16)

    grid = (b_pad // tb,)

    def resident(shape):
        # Constant index_map: block stays in VMEM across all grid steps.
        return pl.BlockSpec(shape, lambda i: (0, 0))

    flops = 2 * b_pad * (D_IN * H1_PAD + H1_PAD * H2_PAD + H2_PAD * OUT_PAD)
    bytes_accessed = (
        xb.size * 2 + (w1b.size + w2b.size + w3b.size) * 2
        + (b1.size + b2.size + b3.size) * 4 + b_pad * OUT_PAD * 4)

    out = pl.pallas_call(
        lenet_kernel,
        out_shape=jax.ShapeDtypeStruct((b_pad, OUT_PAD), jnp.float32),
        grid=grid,
        in_specs=[
            pl.BlockSpec((tb, D_IN), lambda i: (i, 0)),   # x: streamed per tile
            resident((D_IN, H1_PAD)),                     # w1  (784, 384)
            resident((1, H1_PAD)),                        # b1  (1, 384)
            resident((H1_PAD, H2_PAD)),                   # w2  (384, 128)
            resident((1, H2_PAD)),                        # b2  (1, 128)
            resident((H2_PAD, OUT_PAD)),                  # w3  (128, 128)
            resident((1, OUT_PAD)),                       # b3  (1, 128)
        ],
        out_specs=pl.BlockSpec((tb, OUT_PAD), lambda i: (i, 0)),
        compiler_params=pltpu.CompilerParams(
            dimension_semantics=("parallel",)),
        cost_estimate=pl.CostEstimate(
            flops=flops, transcendentals=0, bytes_accessed=bytes_accessed),
    )(xb, w1b, b1, w2b, b2, w3b, b3)

    return out[:b, :N_OUT]


def init_params(key):
    """torch.nn.Linear-style init (U(-1/sqrt(fan_in), 1/sqrt(fan_in))),
    stored transposed (in, out) and zero-padded to the lane-padded dims.
    Padded rows/cols are zero so they never contaminate the real lanes."""
    def linear(key, fan_in, fan_out, in_pad, out_pad):
        kw, kb = jax.random.split(key)
        bound = 1.0 / jnp.sqrt(fan_in)
        w = jax.random.uniform(kw, (fan_in, fan_out), jnp.float32, -bound, bound)
        b = jax.random.uniform(kb, (1, fan_out), jnp.float32, -bound, bound)
        w = jnp.pad(w, ((0, in_pad - fan_in), (0, out_pad - fan_out)))
        b = jnp.pad(b, ((0, 0), (0, out_pad - fan_out)))
        return w, b

    k1, k2, k3 = jax.random.split(key, 3)
    w1, b1 = linear(k1, D_IN, H1, D_IN, H1_PAD)
    w2, b2 = linear(k2, H1, H2, H1_PAD, H2_PAD)
    w3, b3 = linear(k3, H2, N_OUT, H2_PAD, OUT_PAD)
    return (w1, b1, w2, b2, w3, b3)


if __name__ == "__main__":
    key = jax.random.PRNGKey(0)
    kx, kp = jax.random.split(key)

    # MNIST-shaped NCHW input, small batch.
    x = jax.random.normal(kx, (2, 1, 28, 28), jnp.float32)
    params = init_params(kp)

    out = lenet_forward(x, params)
    jax.block_until_ready(out)

    # Pure-JAX reference on the un-padded weight slices, mirroring the
    # kernel's bf16-input / f32-accumulate matmuls.
    w1, b1, w2, b2, w3, b3 = params
    w1r, b1r = w1[:D_IN, :H1], b1[:, :H1]
    w2r, b2r = w2[:H1, :H2], b2[:, :H2]
    w3r, b3r = w3[:H2, :N_OUT], b3[:, :N_OUT]

    def bf16_mm(a, w):
        return jnp.dot(a.astype(jnp.bfloat16), w.astype(jnp.bfloat16),
                       preferred_element_type=jnp.float32)

    xb = x.reshape(-1, D_IN)
    ref = jnp.maximum(bf16_mm(xb, w1r) + b1r, 0.0)
    ref = jnp.maximum(bf16_mm(ref, w2r) + b2r, 0.0)
    ref = bf16_mm(ref, w3r) + b3r

    assert out.shape == (2, N_OUT)
    assert jnp.allclose(out, ref, atol=2e-2, rtol=2e-2), \
        float(jnp.max(jnp.abs(out - ref)))

    print("KERNEL_OK")
</pallas_src>

<mosaic_0001>
module attributes {stable_mosaic.version = 11 : i64} {
  func.func @lenet_kernel(%arg0: i32, %arg1: memref<8x784xbf16, #tpu.memory_space<vmem>>, %arg2: memref<784x384xbf16, #tpu.memory_space<vmem>>, %arg3: memref<1x384xf32, #tpu.memory_space<vmem>>, %arg4: memref<384x128xbf16, #tpu.memory_space<vmem>>, %arg5: memref<1x128xf32, #tpu.memory_space<vmem>>, %arg6: memref<128x128xbf16, #tpu.memory_space<vmem>>, %arg7: memref<1x128xf32, #tpu.memory_space<vmem>>, %arg8: memref<8x128xf32, #tpu.memory_space<vmem>>) attributes {dimension_semantics = [#tpu.dimension_semantics<parallel>], iteration_bounds = array<i64: 1>, scalar_prefetch = 0 : i64, scratch_operands = 0 : i64, tpu.core_type = #tpu.core_type<tc>, window_params = [{transform_indices = @transform_0, window_bounds = array<i64: 8, 784>}, {pipeline_mode = #tpu.pipeline_mode<synchronous>, transform_indices = @transform_1, window_bounds = array<i64: 784, 384>}, {pipeline_mode = #tpu.pipeline_mode<synchronous>, transform_indices = @transform_2, window_bounds = array<i64: 1, 384>}, {pipeline_mode = #tpu.pipeline_mode<synchronous>, transform_indices = @transform_3, window_bounds = array<i64: 384, 128>}, {pipeline_mode = #tpu.pipeline_mode<synchronous>, transform_indices = @transform_4, window_bounds = array<i64: 1, 128>}, {pipeline_mode = #tpu.pipeline_mode<synchronous>, transform_indices = @transform_5, window_bounds = array<i64: 128, 128>}, {pipeline_mode = #tpu.pipeline_mode<synchronous>, transform_indices = @transform_6, window_bounds = array<i64: 1, 128>}, {transform_indices = @transform_7, window_bounds = array<i64: 8, 128>}]} {
    %c0 = arith.constant 0 : index
    %c0_0 = arith.constant 0 : index
    %0 = vector.load %arg1[%c0, %c0_0] : memref<8x784xbf16, #tpu.memory_space<vmem>>, vector<8x784xbf16>
    %c0_1 = arith.constant 0 : index
    %c0_2 = arith.constant 0 : index
    %1 = vector.load %arg2[%c0_1, %c0_2] : memref<784x384xbf16, #tpu.memory_space<vmem>>, vector<784x384xbf16>
    %cst = arith.constant dense<0.000000e+00> : vector<8x384xf32>
    %2 = tpu.matmul %0, %1, %cst {dimension_numbers = #tpu.dot_dimension_numbers<[1], [0], [0], [1], [0, 0, 1, 1], [], []>} : vector<8x784xbf16>, vector<784x384xbf16>, vector<8x384xf32> -> vector<8x384xf32>
    %c0_3 = arith.constant 0 : index
    %c0_4 = arith.constant 0 : index
    %3 = vector.load %arg3[%c0_3, %c0_4] : memref<1x384xf32, #tpu.memory_space<vmem>>, vector<1x384xf32>
    %4 = vector.broadcast %3 : vector<1x384xf32> to vector<8x384xf32>
    %5 = arith.addf %2, %4 : vector<8x384xf32>
    %cst_5 = arith.constant 0.000000e+00 : f32
    %6 = vector.broadcast %cst_5 : f32 to vector<8x384xf32>
    %7 = arith.maximumf %5, %6 : vector<8x384xf32>
    %8 = arith.truncf %7 : vector<8x384xf32> to vector<8x384xbf16>
    %c0_6 = arith.constant 0 : index
    %c0_7 = arith.constant 0 : index
    %9 = vector.load %arg4[%c0_6, %c0_7] : memref<384x128xbf16, #tpu.memory_space<vmem>>, vector<384x128xbf16>
    %cst_8 = arith.constant dense<0.000000e+00> : vector<8x128xf32>
    %10 = tpu.matmul %8, %9, %cst_8 {dimension_numbers = #tpu.dot_dimension_numbers<[1], [0], [0], [1], [0, 0, 1, 1], [], []>} : vector<8x384xbf16>, vector<384x128xbf16>, vector<8x128xf32> -> vector<8x128xf32>
    %c0_9 = arith.constant 0 : index
    %c0_10 = arith.constant 0 : index
    %11 = vector.load %arg5[%c0_9, %c0_10] : memref<1x128xf32, #tpu.memory_space<vmem>>, vector<1x128xf32>
    %12 = vector.broadcast %11 : vector<1x128xf32> to vector<8x128xf32>
    %13 = arith.addf %10, %12 : vector<8x128xf32>
    %cst_11 = arith.constant 0.000000e+00 : f32
    %14 = vector.broadcast %cst_11 : f32 to vector<8x128xf32>
    %15 = arith.maximumf %13, %14 : vector<8x128xf32>
    %16 = arith.truncf %15 : vector<8x128xf32> to vector<8x128xbf16>
    %c0_12 = arith.constant 0 : index
    %c0_13 = arith.constant 0 : index
    %17 = vector.load %arg6[%c0_12, %c0_13] : memref<128x128xbf16, #tpu.memory_space<vmem>>, vector<128x128xbf16>
    %cst_14 = arith.constant dense<0.000000e+00> : vector<8x128xf32>
    %18 = tpu.matmul %16, %17, %cst_14 {dimension_numbers = #tpu.dot_dimension_numbers<[1], [0], [0], [1], [0, 0, 1, 1], [], []>} : vector<8x128xbf16>, vector<128x128xbf16>, vector<8x128xf32> -> vector<8x128xf32>
    %c0_15 = arith.constant 0 : index
    %c0_16 = arith.constant 0 : index
    %19 = vector.load %arg7[%c0_15, %c0_16] : memref<1x128xf32, #tpu.memory_space<vmem>>, vector<1x128xf32>
    %20 = vector.broadcast %19 : vector<1x128xf32> to vector<8x128xf32>
    %21 = arith.addf %18, %20 : vector<8x128xf32>
    %c0_17 = arith.constant 0 : index
    %c0_18 = arith.constant 0 : index
    %22 = vector.load %arg8[%c0_17, %c0_18] : memref<8x128xf32, #tpu.memory_space<vmem>>, vector<8x128xf32>
    tpu.vector_store %arg8[%c0_17, %c0_18], %21 {strides = array<i32>} : memref<8x128xf32, #tpu.memory_space<vmem>>, vector<8x128xf32>,
    return
  }
  func.func @transform_0(%arg0: i32) -> (i32, i32) {
    %c0_i32 = arith.constant 0 : i32
    %c0_i32_0 = arith.constant 0 : i32
    return %arg0, %c0_i32 : i32, i32
  }
  func.func @transform_1(%arg0: i32) -> (i32, i32) {
    %c0_i32 = arith.constant 0 : i32
    %c0_i32_0 = arith.constant 0 : i32
    %c0_i32_1 = arith.constant 0 : i32
    return %c0_i32, %c0_i32_0 : i32, i32
  }
  func.func @transform_2(%arg0: i32) -> (i32, i32) {
    %c0_i32 = arith.constant 0 : i32
    %c0_i32_0 = arith.constant 0 : i32
    %c0_i32_1 = arith.constant 0 : i32
    return %c0_i32, %c0_i32_0 : i32, i32
  }
  func.func @transform_3(%arg0: i32) -> (i32, i32) {
    %c0_i32 = arith.constant 0 : i32
    %c0_i32_0 = arith.constant 0 : i32
    %c0_i32_1 = arith.constant 0 : i32
    return %c0_i32, %c0_i32_0 : i32, i32
  }
  func.func @transform_4(%arg0: i32) -> (i32, i32) {
    %c0_i32 = arith.constant 0 : i32
    %c0_i32_0 = arith.constant 0 : i32
    %c0_i32_1 = arith.constant 0 : i32
    return %c0_i32, %c0_i32_0 : i32, i32
  }
  func.func @transform_5(%arg0: i32) -> (i32, i32) {
    %c0_i32 = arith.constant 0 : i32
    %c0_i32_0 = arith.constant 0 : i32
    %c0_i32_1 = arith.constant 0 : i32
    return %c0_i32, %c0_i32_0 : i32, i32
  }
  func.func @transform_6(%arg0: i32) -> (i32, i32) {
    %c0_i32 = arith.constant 0 : i32
    %c0_i32_0 = arith.constant 0 : i32
    %c0_i32_1 = arith.constant 0 : i32
    return %c0_i32, %c0_i32_0 : i32, i32
  }
  func.func @transform_7(%arg0: i32) -> (i32, i32) {
    %c0_i32 = arith.constant 0 : i32
    %c0_i32_0 = arith.constant 0 : i32
    return %arg0, %c0_i32 : i32, i32
  }
}

</mosaic_0001>

<bundles_post_ra>
// kernel: tpu_custom_call.1
= control target key start
LH: loop header
LB: loop body
LE: loop exit
PB: predicated region body
PF: predicated region fallthrough
CT: control target
= control target key end

     0   :  { %12 = vsyncpa [#allocation3], 0  ;;  %s2676_s0 = inlined_call_operand.hbm [shape: bf16[8,784], index: 0, kind: input, shape index: {}]   ;;  %s2677_s1 = inlined_call_operand.hbm [shape: bf16[784,384], index: 1, kind: input, shape index: {}]   ;;  %s2678_s2 = inlined_call_operand.vmem [shape: f32[1,384], index: 2, kind: input, shape index: {}]   ;;  %s2679_s3 = inlined_call_operand.hbm [shape: bf16[384,128], index: 3, kind: input, shape index: {}]   ;;  %s2680_s4 = inlined_call_operand.vmem [shape: f32[1,128], index: 4, kind: input, shape index: {}]   ;;  %s2681_s5 = inlined_call_operand.hbm [shape: bf16[128,128], index: 5, kind: input, shape index: {}]   ;;  %s2682_s6 = inlined_call_operand.vmem [shape: f32[1,128], index: 6, kind: input, shape index: {}]   ;;  %s2683_s7 = inlined_call_operand.hbm [shape: f32[8,128], index: 7, kind: output, shape index: {}]  }
   0x1   :  { %13 = vsyncpa [#allocation6], 0 }
   0x2   :  { %14 = vsyncpa [#allocation9], 0 }
   0x3   :  { %15 = vsyncpa [#allocation4], 0  ;;  %s2549_s24 = smov [#allocation5]  }
   0x4   :  { %s31_s25 = sshll.u32 %s2549_s24, 4  ;;  %s32_s25 = int_to_ptr.vmem [resolvable:$true] %s31_s25 }
   0x5   :  { %s2449_s26 = scalar_lea.vmem %s32_s25, 18816  ;;  %p2454_p1 = scmp.lt.s32.totalorder %s32_s25, %s32_s25 }
   0x6   :  { %p2450_p0 = scmp.ne.s32.totalorder %s32_s25, %s2449_s26  ;;  %p2455_p2 = scmp.lt.s32.totalorder %s2449_s26, %s2449_s26 }
   0x8   :  { %p2456_p3 = por %p2455_p2, %p2454_p1 }
   0xa   :  { %p2457_p4 = pnand %p2456_p3, %p2450_p0 }
   0xc   :  { %2460 = shalt.err (!%p2457_p4)
}
   0xd   :  { %s2550_s27 = smov 192   ;;  %s2551_s28 = smov 12  }
   0xe   :  { %37 = dma.hbm_to_vmem [thread:$0]  %s2677_s1, 18816, %s32_s25, [#allocation6], %s2550_s27, %s2550_s27, %s2551_s28  }
   0xf   :  { %s2552_s8 = smov [#allocation2]   ;;  %s2553_s10 = smov [#allocation7]  }
  0x10   :  { %s22_s9 = sshll.u32 %s2552_s8, 4  ;;  %s45_s11 = sshll.u32 %s2553_s10, 4  ;;  %s23_s9 = int_to_ptr.vmem [resolvable:$true] %s22_s9  ;;  %s46_s11 = int_to_ptr.vmem [resolvable:$true] %s45_s11 }
  0x11   :  { %s2469_s12 = scalar_lea.vmem %s23_s9, 448  ;;  %p2474_p6 = scmp.lt.s32.totalorder %s23_s9, %s23_s9 }
  0x12   :  { %p2470_p5 = scmp.ne.s32.totalorder %s23_s9, %s2469_s12  ;;  %p2475_p7 = scmp.lt.s32.totalorder %s2469_s12, %s2469_s12 }
  0x14   :  { %p2476_p8 = por %p2475_p7, %p2474_p6 }
  0x16   :  { %p2477_p9 = pnand %p2476_p8, %p2470_p5 }
  0x18   :  { %2480 = shalt.err (!%p2477_p9)
}
  0x19   :  { %25 = dma.hbm_to_vmem [thread:$0]  %s2676_s0, 448, %s23_s9, [#allocation3]  }
  0x1a   :  { %s2489_s15 = scalar_lea.vmem %s46_s11, 3072  ;;  %p2494_p11 = scmp.lt.s32.totalorder %s46_s11, %s46_s11 }
  0x1b   :  { %p2490_p10 = scmp.ne.s32.totalorder %s46_s11, %s2489_s15  ;;  %p2495_p12 = scmp.lt.s32.totalorder %s2489_s15, %s2489_s15 }
  0x1d   :  { %p2496_p13 = por %p2495_p12, %p2494_p11 }
  0x1f   :  { %p2497_p0 = pnand %p2496_p13, %p2490_p10 }
  0x21   :  { %2500 = shalt.err (!%p2497_p0)
}
  0x22   :  { %s2554_s1 = smov 64   ;;  %s2555_s16 = smov 4  }
  0x23   :  { %51 = dma.hbm_to_vmem [thread:$0]  %s2679_s3, 3072, %s46_s11, [#allocation6], %s2554_s1, %s2554_s1, %s2555_s16  }
  0x24   :  { %s2556_s19 = smov [#allocation8]  }
  0x25   :  { %s59_s20 = sshll.u32 %s2556_s19, 4  ;;  %s60_s20 = int_to_ptr.vmem [resolvable:$true] %s59_s20 }
  0x26   :  { %s2509_s21 = scalar_lea.vmem %s60_s20, 1024  ;;  %p2514_p2 = scmp.lt.s32.totalorder %s60_s20, %s60_s20 }
  0x27   :  { %p2510_p1 = scmp.ne.s32.totalorder %s60_s20, %s2509_s21  ;;  %p2515_p3 = scmp.lt.s32.totalorder %s2509_s21, %s2509_s21 }
  0x29   :  { %p2516_p4 = por %p2515_p3, %p2514_p2 }
  0x2b   :  { %p2517_p5 = pnand %p2516_p4, %p2510_p1 }
  0x2d   :  { %2520 = shalt.err (!%p2517_p5)
}
  0x2e   :  { %65 = dma.hbm_to_vmem [thread:$0]  %s2681_s5, 1024, %s60_s20, [#allocation9], %s2554_s1, %s2554_s1, %s2555_s16  }
  0x2f   :  { %2541 = dma.done.wait [#allocation3], 448  }
  0x30   :  { %2542 = vsyncadd [#allocation3], 4294966848 }
  0x31   :  { %2543 = dma.done.wait [#allocation6], 21888  }
  0x32   :  { %2544 = vsyncadd [#allocation6], 4294945408 }
  0x33   :  { %2545 = dma.done.wait [#allocation9], 1024  }
  0x34   :  { %2546 = vsyncadd [#allocation9], 4294966272  ;;  %v2206_v0 = vld [vmem:[#allocation5 + $0xac] ss:$12 sps:$4 sm:$0xff]   ;;  %v2208_v1 = vld [vmem:[#allocation5 + $0xa8] ss:$12 sps:$4 sm:$0xff]  }
  0x35   :  { %1110 = vmatprep.subr.bf16.mxu0 %v2206_v0  ;;  %v2209_v2 = vld [vmem:[#allocation5 + $0x22c] ss:$12 sps:$4 sm:$0xff]   ;;  %v2211_v3 = vld [vmem:[#allocation5 + $0x228] ss:$12 sps:$4 sm:$0xff]   ;;  %v2214_v5 = vld [vmem:[#allocation5 + $0x90] ss:$12 sps:$4 sm:$0xff]  }
  0x36   :  { %1111 = vmatpush1.bf16.msra.mxu0 %v2208_v1  ;;  %v2212_v4 = vld [vmem:[#allocation5 + $0x94] ss:$12 sps:$4 sm:$0xff]   ;;  %1151 = vmatprep.subr.bf16.mxu1 %v2209_v2  ;;  %v2217_v7 = vld [vmem:[#allocation5 + $0x210] ss:$12 sps:$4 sm:$0xff]   ;;  %v2220_v9 = vld [vmem:[#allocation5 + $0x78] ss:$12 sps:$4 sm:$0xff]  }
  0x37   :  { %v2215_v6 = vld [vmem:[#allocation5 + $0x214] ss:$12 sps:$4 sm:$0xff]   ;;  %1152 = vmatpush1.bf16.msra.mxu1 %v2211_v3  ;;  %1112 = vmatprep.subr.bf16.mxu0 %v2212_v4  ;;  %v2218_v8 = vld [vmem:[#allocation5 + $0x7c] ss:$12 sps:$4 sm:$0xff]   ;;  %v2224_v11 = vld [vmem:[#allocation5 + $0x64] ss:$12 sps:$4 sm:$0xff]  }
  0x38   :  { %1153 = vmatprep.subr.bf16.mxu1 %v2215_v6  ;;  %v2221_v10 = vld [vmem:[#allocation5 + $0x1fc] ss:$12 sps:$4 sm:$0xff]   ;;  %v2223_v12 = vld [vmem:[#allocation5 + $0x1f8] ss:$12 sps:$4 sm:$0xff]   ;;  %v2226_v14 = vld [vmem:[#allocation5 + $0x60] ss:$12 sps:$4 sm:$0xff]  }
  0x39   :  { %v2227_v13 = vld [vmem:[#allocation5 + $0x1e4] ss:$12 sps:$4 sm:$0xff]   ;;  %v2230_v15 = vld [vmem:[#allocation5 + $0x4c] ss:$12 sps:$4 sm:$0xff]   ;;  %v2232_v18 = vld [vmem:[#allocation5 + $0x48] ss:$12 sps:$4 sm:$0xff]  }
  0x3a   :  { %1113 = vmatpush1.bf16.msra.mxu0 %v2214_v5  ;;  %v2229_v16 = vld [vmem:[#allocation5 + $0x1e0] ss:$12 sps:$4 sm:$0xff]   ;;  %v2235_v20 = vld [vmem:[#allocation5 + $0x1c8] ss:$12 sps:$4 sm:$0xff]   ;;  %v2238_v22 = vld [vmem:[#allocation5 + $0x30] ss:$12 sps:$4 sm:$0xff]  }
  0x3b   :  { %1114 = vmatprep.subr.bf16.mxu0 %v2218_v8  ;;  %1154 = vmatpush1.bf16.msra.mxu1 %v2217_v7  ;;  %v2233_v17 = vld [vmem:[#allocation5 + $0x1cc] ss:$12 sps:$4 sm:$0xff]   ;;  %v2236_v19 = vld [vmem:[#allocation5 + $0x34] ss:$12 sps:$4 sm:$0xff]   ;;  %v2242_v23 = vld [vmem:[#allocation5 + $0x1c] ss:$12 sps:$4 sm:$0xff]  }
  0x3c   :  { %1155 = vmatprep.subr.bf16.mxu1 %v2221_v10  ;;  %v2239_v21 = vld [vmem:[#allocation5 + $0x1b4] ss:$12 sps:$4 sm:$0xff]   ;;  %v2241_v24 = vld [vmem:[#allocation5 + $0x1b0] ss:$12 sps:$4 sm:$0xff]   ;;  %v2244_v26 = vld [vmem:[#allocation5 + $0x18] ss:$12 sps:$4 sm:$0xff]  }
  0x3d   :  { %v2245_v25 = vld [vmem:[#allocation5 + $0x19c] ss:$12 sps:$4 sm:$0xff]   ;;  %v2248_v27 = vld [vmem:[#allocation5 + $0x4] ss:$12 sps:$4 sm:$0xff]   ;;  %v2250_v30 = vld [vmem:[#allocation5] ss:$12 sps:$4 sm:$0xff]  }
  0x3e   :  { %1115 = vmatpush1.bf16.msra.mxu0 %v2220_v9  ;;  %v2247_v28 = vld [vmem:[#allocation5 + $0x198] ss:$12 sps:$4 sm:$0xff]   ;;  %v2253_v32 = vld [vmem:[#allocation5 + $0x180] ss:$12 sps:$4 sm:$0xff]   ;;  %v2256_v34 = vld [vmem:[#allocation5 + $0x168] ss:$12 sps:$4 sm:$0xff]  }
  0x3f   :  { %1116 = vmatprep.subr.bf16.mxu0 %v2224_v11  ;;  %1156 = vmatpush1.bf16.msra.mxu1 %v2223_v12  ;;  %v2251_v29 = vld [vmem:[#allocation5 + $0x184] ss:$12 sps:$4 sm:$0xff]   ;;  %v2254_v31 = vld [vmem:[#allocation5 + $0x16c] ss:$12 sps:$4 sm:$0xff]   ;;  %v2260_v35 = vld [vmem:[#allocation5 + $0x154] ss:$12 sps:$4 sm:$0xff]  }
  0x40   :  { %1157 = vmatprep.subr.bf16.mxu1 %v2227_v13  ;;  %v2257_v33 = vld [vmem:[#allocation5 + $0x2ec] ss:$12 sps:$4 sm:$0xff]   ;;  %v2259_v36 = vld [vmem:[#allocation5 + $0x2e8] ss:$12 sps:$4 sm:$0xff]   ;;  %v2262_v38 = vld [vmem:[#allocation5 + $0x150] ss:$12 sps:$4 sm:$0xff]  }
  0x41   :  { %v2263_v37 = vld [vmem:[#allocation5 + $0x2d4] ss:$12 sps:$4 sm:$0xff]   ;;  %v2266_v39 = vld [vmem:[#allocation5 + $0x13c] ss:$12 sps:$4 sm:$0xff]   ;;  %v2268_v42 = vld [vmem:[#allocation5 + $0x138] ss:$12 sps:$4 sm:$0xff]  }
  0x42   :  { %1117 = vmatpush1.bf16.msra.mxu0 %v2226_v14  ;;  %v2265_v40 = vld [vmem:[#allocation5 + $0x2d0] ss:$12 sps:$4 sm:$0xff]   ;;  %v2271_v44 = vld [vmem:[#allocation5 + $0x2b8] ss:$12 sps:$4 sm:$0xff]   ;;  %v2274_v47 = vld [vmem:[#allocation5 + $0x120] ss:$12 sps:$4 sm:$0xff]  }
  0x43   :  { %1118 = vmatprep.subr.bf16.mxu0 %v2230_v15  ;;  %1158 = vmatpush1.bf16.msra.mxu1 %v2229_v16  ;;  %v2269_v41 = vld [vmem:[#allocation5 + $0x2bc] ss:$12 sps:$4 sm:$0xff]   ;;  %v2272_v43 = vld [vmem:[#allocation5 + $0x124] ss:$12 sps:$4 sm:$0xff]   ;;  %v2278_v49 = vld [vmem:[#allocation5 + $0x10c] ss:$12 sps:$4 sm:$0xff]  }
  0x44   :  { %1159 = vmatprep.subr.bf16.mxu1 %v2233_v17  ;;  %v2275_v45 = vld [vmem:[#allocation5 + $0x2a4] ss:$12 sps:$4 sm:$0xff]   ;;  %v2277_v51 = vld [vmem:[#allocation5 + $0x2a0] ss:$12 sps:$4 sm:$0xff]   ;;  %v2280_v54 = vld [vmem:[#allocation5 + $0x108] ss:$12 sps:$4 sm:$0xff]  }
  0x45   :  { %v81_v46 = vld [vmem:[#allocation2] sm:$0xff]  ;;  %v82_v50 = vld [vmem:[#allocation2 + $0x8] sm:$0xff]  ;;  %v2284_v55 = vld [vmem:[#allocation5 + $0xf4] ss:$12 sps:$4 sm:$0xff]   ;;  %vm1106_vm0 = vcmask 130048   ;;  %vm2559_vm1 = vmmov 0  }
  0x46   :  { %1119 = vmatpush1.bf16.msra.mxu0 %v2232_v18  ;;  %v1851_v48 = vcombine.high %v81_v46, %v81_v46  ;;  %v2613_v52 = vcombine.high %v82_v50, %v82_v50  ;;  %v2281_v53 = vld [vmem:[#allocation5 + $0x28c] ss:$12 sps:$4 sm:$0xff]   ;;  %v2283_v56 = vld [vmem:[#allocation5 + $0x288] ss:$12 sps:$4 sm:$0xff]   ;;  %v2286_v58 = vld [vmem:[#allocation5 + $0xf0] ss:$12 sps:$4 sm:$0xff]   ;;  %v2616_v5 = vcombine.low %v81_v46, %v81_v46  ;;  %v2618_v8 = vcombine.low %v82_v50, %v82_v50 }
  0x47   :  { %1120 = vmatprep.subr.bf16.mxu0 %v2236_v19  ;;  %1160 = vmatpush1.bf16.msra.mxu1 %v2235_v20  ;;  %v2287_v57 = vld [vmem:[#allocation5 + $0x274] ss:$12 sps:$4 sm:$0xff]   ;;  %v2290_v59 = vld [vmem:[#allocation5 + $0xdc] ss:$12 sps:$4 sm:$0xff]   ;;  %v2292_v62 = vld [vmem:[#allocation5 + $0xd8] ss:$12 sps:$4 sm:$0xff]  }
  0x48   :  { %1161 = vmatprep.subr.bf16.mxu1 %v2239_v21  ;;  %1142 = vmatprep.mubr.bf16.mxu0 %v1851_v48  ;;  %v2289_v60 = vld [vmem:[#allocation5 + $0x270] ss:$12 sps:$4 sm:$0xff]   ;;  %v2295_v0 = vld [vmem:[#allocation5 + $0x258] ss:$12 sps:$4 sm:$0xff]   ;;  %v2298_v2 = vld [vmem:[#allocation5 + $0xc0] ss:$12 sps:$4 sm:$0xff]  }
  0x49   :  { %1183 = vmatprep.mubr.bf16.mxu1 %v2613_v52  ;;  %v2293_v61 = vld [vmem:[#allocation5 + $0x25c] ss:$12 sps:$4 sm:$0xff]   ;;  %v2296_v63 = vld [vmem:[#allocation5 + $0xc4] ss:$12 sps:$4 sm:$0xff]   ;;  %v2306_v3 = vld [vmem:[#allocation5 + $0x3ac] ss:$12 sps:$4 sm:$0xff]  }
  0x4a   :  { %1121 = vmatpush1.bf16.msra.mxu0 %v2238_v22  ;;  %v2299_v1 = vld [vmem:[#allocation5 + $0x244] ss:$12 sps:$4 sm:$0xff]   ;;  %v2303_v4 = vld [vmem:[#allocation5 + $0x240] ss:$12 sps:$4 sm:$0xff]   ;;  %v2304_v7 = vld [vmem:[#allocation5 + $0x3a8] ss:$12 sps:$4 sm:$0xff]  }
  0x4b   :  { %1122 = vmatprep.subr.bf16.mxu0 %v2242_v23  ;;  %1162 = vmatpush1.bf16.msra.mxu1 %v2241_v24  ;;  %v2312_v6 = vld [vmem:[#allocation5 + $0x170] ss:$12 sps:$4 sm:$0xff]   ;;  %v2311_v9 = vld [vmem:[#allocation5 + $0x394] ss:$12 sps:$4 sm:$0xff]   ;;  %v2317_v11 = vld [vmem:[#allocation5 + $0x158] ss:$12 sps:$4 sm:$0xff]  }
  0x4c   :  { %1163 = vmatprep.subr.bf16.mxu1 %v2245_v25  ;;  %v2313_v10 = vld [vmem:[#allocation5 + $0xb0] ss:$12 sps:$4 sm:$0xff]   ;;  %v2318_v14 = vld [vmem:[#allocation5 + $0x98] ss:$12 sps:$4 sm:$0xff]   ;;  %v2322_v15 = vld [vmem:[#allocation5 + $0x140] ss:$12 sps:$4 sm:$0xff]  }
  0x4d   :  { %v2309_v12 = vld [vmem:[#allocation5 + $0x390] ss:$12 sps:$4 sm:$0xff]   ;;  %v2314_v16 = vld [vmem:[#allocation5 + $0x378] ss:$12 sps:$4 sm:$0xff]   ;;  %v2323_v18 = vld [vmem:[#allocation5 + $0x80] ss:$12 sps:$4 sm:$0xff]  }
  0x4e   :  { %1123 = vmatpush1.bf16.msra.mxu0 %v2244_v26  ;;  %v2316_v13 = vld [vmem:[#allocation5 + $0x37c] ss:$12 sps:$4 sm:$0xff]   ;;  %v2321_v17 = vld [vmem:[#allocation5 + $0x364] ss:$12 sps:$4 sm:$0xff]   ;;  %v2319_v20 = vld [vmem:[#allocation5 + $0x360] ss:$12 sps:$4 sm:$0xff]  }
  0x4f   :  { %1124 = vmatprep.subr.bf16.mxu0 %v2248_v27  ;;  %1164 = vmatpush1.bf16.msra.mxu1 %v2247_v28  ;;  %v2327_v19 = vld [vmem:[#allocation5 + $0x128] ss:$12 sps:$4 sm:$0xff]   ;;  %v2326_v21 = vld [vmem:[#allocation5 + $0x34c] ss:$12 sps:$4 sm:$0xff]   ;;  %v2332_v23 = vld [vmem:[#allocation5 + $0x110] ss:$12 sps:$4 sm:$0xff]  }
  0x50   :  { %1165 = vmatprep.subr.bf16.mxu1 %v2251_v29  ;;  %v2328_v22 = vld [vmem:[#allocation5 + $0x68] ss:$12 sps:$4 sm:$0xff]   ;;  %v2333_v26 = vld [vmem:[#allocation5 + $0x50] ss:$12 sps:$4 sm:$0xff]   ;;  %v2337_v27 = vld [vmem:[#allocation5 + $0xf8] ss:$12 sps:$4 sm:$0xff]  }
  0x51   :  { %v2324_v24 = vld [vmem:[#allocation5 + $0x348] ss:$12 sps:$4 sm:$0xff]   ;;  %v2329_v28 = vld [vmem:[#allocation5 + $0x330] ss:$12 sps:$4 sm:$0xff]   ;;  %v2354_v50 = vld [vmem:[#allocation5 + $0x438] ss:$12 sps:$4 sm:$0xff]  }
  0x52   :  { %1125 = vmatpush1.bf16.msra.mxu0 %v2250_v30  ;;  %v2331_v25 = vld [vmem:[#allocation5 + $0x334] ss:$12 sps:$4 sm:$0xff]   ;;  %v2336_v29 = vld [vmem:[#allocation5 + $0x31c] ss:$12 sps:$4 sm:$0xff]   ;;  %v2338_v30 = vld [vmem:[#allocation5 + $0x38] ss:$12 sps:$4 sm:$0xff]  }
  0x53   :  { %1126 = vmatprep.subr.bf16.mxu0 %v2254_v31  ;;  %1166 = vmatpush1.bf16.msra.mxu1 %v2253_v32  ;;  %v2342_v31 = vld [vmem:[#allocation5 + $0xe0] ss:$12 sps:$4 sm:$0xff]   ;;  %v2334_v32 = vld [vmem:[#allocation5 + $0x318] ss:$12 sps:$4 sm:$0xff]   ;;  %v2349_v46 = vld [vmem:[#allocation5 + $0x450] ss:$12 sps:$4 sm:$0xff]  }
  0x54   :  { %1167 = vmatprep.subr.bf16.mxu1 %v2257_v33  ;;  %v2341_v33 = vld [vmem:[#allocation5 + $0x304] ss:$12 sps:$4 sm:$0xff]   ;;  %s2560_s26 = smov [#allocation10]  }
  0x55   :  { %s1839_s27 = sshll.u32 %s2560_s26, 4  ;;  %s1840_s27 = int_to_ptr.vmem [resolvable:$true] %s1839_s27 }
  0x56   :  { %1127 = vmatpush2.bf16.msra.mxu0 %v2256_v34  ;;  %v2343_v34 = vld [vmem:[#allocation5 + $0x20] ss:$12 sps:$4 sm:$0xff]   ;;  %p2526_p7 = scmp.lt.s32.totalorder %s1840_s27, %s1840_s27 }
  0x57   :  { %1128 = vmatprep.subr.bf16.mxu0 %v2260_v35  ;;  %1168 = vmatpush2.bf16.msra.mxu1 %v2259_v36  ;;  %v2347_v35 = vld [vmem:[#allocation5 + $0xc8] ss:$12 sps:$4 sm:$0xff]   ;;  %v2339_v36 = vld [vmem:[#allocation5 + $0x300] ss:$12 sps:$4 sm:$0xff]  }
  0x58   :  { %1169 = vmatprep.subr.bf16.mxu1 %v2263_v37  ;;  %v2346_v37 = vld [vmem:[#allocation5 + $0x46c] ss:$12 sps:$4 sm:$0xff]  }
  0x5a   :  { %1129 = vmatpush2.bf16.msra.mxu0 %v2262_v38  ;;  %v2348_v38 = vld [vmem:[#allocation5 + $0x8] ss:$12 sps:$4 sm:$0xff]  }
  0x5b   :  { %1130 = vmatprep.subr.bf16.mxu0 %v2266_v39  ;;  %1170 = vmatpush2.bf16.msra.mxu1 %v2265_v40  ;;  %v2622_v39 = vld [vmem:[#allocation2 + $0x10] sm:$0xff]  ;;  %v2352_v40 = vld [vmem:[#allocation5 + $0x2f0] ss:$12 sps:$4 sm:$0xff]  }
  0x5c   :  { %1171 = vmatprep.subr.bf16.mxu1 %v2269_v41  ;;  %v2626_v41 = vcombine.high %v2622_v39, %v2622_v39 }
  0x5e   :  { %1131 = vmatpush2.bf16.msra.mxu0 %v2268_v42  ;;  %v2344_v42 = vld [vmem:[#allocation5 + $0x468] ss:$12 sps:$4 sm:$0xff]  }
  0x5f   :  { %1132 = vmatprep.subr.bf16.mxu0 %v2272_v43  ;;  %1172 = vmatpush2.bf16.msra.mxu1 %v2271_v44  ;;  %v2351_v43 = vld [vmem:[#allocation5 + $0x454] ss:$12 sps:$4 sm:$0xff]   ;;  %v2353_v44 = vld [vmem:[#allocation5 + $0x230] ss:$12 sps:$4 sm:$0xff]  }
  0x60   :  { %1173 = vmatprep.subr.bf16.mxu1 %v2275_v45  ;;  %v2357_v45 = vld [vmem:[#allocation5 + $0x2d8] ss:$12 sps:$4 sm:$0xff]  }
  0x62   :  { %1133 = vmatpush2.bf16.msra.mxu0 %v2274_v47  ;;  %v2356_v47 = vld [vmem:[#allocation5 + $0x43c] ss:$12 sps:$4 sm:$0xff]  }
  0x63   :  { %1134 = vmatprep.subr.bf16.mxu0 %v2278_v49  ;;  %1174 = vmatpush2.bf16.msra.mxu1 %v2277_v51  ;;  %v2362_v49 = vld [vmem:[#allocation5 + $0x2c0] ss:$12 sps:$4 sm:$0xff]   ;;  %v2361_v51 = vld [vmem:[#allocation5 + $0x424] ss:$12 sps:$4 sm:$0xff]  }
  0x64   :  { %1175 = vmatprep.subr.bf16.mxu1 %v2281_v53  ;;  %v2363_v53 = vld [vmem:[#allocation5 + $0x200] ss:$12 sps:$4 sm:$0xff]  }
  0x66   :  { %1135 = vmatpush2.bf16.msra.mxu0 %v2280_v54  ;;  %v2367_v54 = vld [vmem:[#allocation5 + $0x2a8] ss:$12 sps:$4 sm:$0xff]  }
  0x67   :  { %1136 = vmatprep.subr.bf16.mxu0 %v2284_v55  ;;  %1176 = vmatpush2.bf16.msra.mxu1 %v2283_v56  ;;  %v2359_v55 = vld [vmem:[#allocation5 + $0x420] ss:$12 sps:$4 sm:$0xff]  }
  0x68   :  { %1177 = vmatprep.subr.bf16.mxu1 %v2287_v57  ;;  %v2366_v56 = vld [vmem:[#allocation5 + $0x40c] ss:$12 sps:$4 sm:$0xff]   ;;  %v2368_v57 = vld [vmem:[#allocation5 + $0x1e8] ss:$12 sps:$4 sm:$0xff]  }
  0x6a   :  { %1137 = vmatpush2.bf16.msra.mxu0 %v2286_v58  ;;  %v2372_v58 = vld [vmem:[#allocation5 + $0x290] ss:$12 sps:$4 sm:$0xff]  }
  0x6b   :  { %1138 = vmatprep.subr.bf16.mxu0 %v2290_v59  ;;  %1178 = vmatpush2.bf16.msra.mxu1 %v2289_v60  ;;  %v2371_v59 = vld [vmem:[#allocation5 + $0x3f4] ss:$12 sps:$4 sm:$0xff]   ;;  %v2369_v60 = vld [vmem:[#allocation5 + $0x3f0] ss:$12 sps:$4 sm:$0xff]  }
  0x6c   :  { %1179 = vmatprep.subr.bf16.mxu1 %v2293_v61  ;;  %v2373_v61 = vld [vmem:[#allocation5 + $0x1d0] ss:$12 sps:$4 sm:$0xff]  }
  0x6e   :  { %1139 = vmatpush2.bf16.msra.mxu0 %v2292_v62  ;;  %v2376_v62 = vld [vmem:[#allocation5 + $0x3dc] ss:$12 sps:$4 sm:$0xff]  }
  0x6f   :  { %1140 = vmatprep.subr.bf16.mxu0 %v2296_v63  ;;  %1180 = vmatpush2.bf16.msra.mxu1 %v2295_v0  ;;  %v2377_v63 = vld [vmem:[#allocation5 + $0x278] ss:$12 sps:$4 sm:$0xff]  }
  0x70   :  { %1181 = vmatprep.subr.bf16.mxu1 %v2299_v1  ;;  %v2378_v0 = vld [vmem:[#allocation5 + $0x1b8] ss:$12 sps:$4 sm:$0xff]   ;;  %v2382_v1 = vld [vmem:[#allocation5 + $0x260] ss:$12 sps:$4 sm:$0xff]  }
  0x72   :  { %1141 = vmatpush2.bf16.msra.mxu0 %v2298_v2  ;;  %v2374_v2 = vld [vmem:[#allocation5 + $0x3d8] ss:$12 sps:$4 sm:$0xff]  }
  0x73   :  { %1192 = vmatprep.subr.bf16.mxu0 %v2306_v3  ;;  %1182 = vmatpush2.bf16.msra.mxu1 %v2303_v4  ;;  %v2381_v3 = vld [vmem:[#allocation5 + $0x3c4] ss:$12 sps:$4 sm:$0xff]   ;;  %v2385_v4 = vld [vmem:[#allocation5 + $0x1a0] ss:$12 sps:$4 sm:$0xff]  }
  0x74   :  { %2040 = vmatprep.subr.bf16.mxu1 %v2312_v6  ;;  %v2379_v6 = vld [vmem:[#allocation5 + $0x3c0] ss:$12 sps:$4 sm:$0xff]  }
  0x75   :  { %1143 = vmatmul.mubr.bf16.vlgmr.msra.gmra.mxu0 %v2616_v5 }
  0x76   :  { %1193 = vmatpush1.bf16.msra.mxu0 %v2304_v7  ;;  %1184 = vmatmul.mubr.bf16.vlgmr.msra.gmra.mxu1 %v2618_v8  ;;  %v2388_v7 = vld [vmem:[#allocation5 + $0x484] ss:$12 sps:$4 sm:$0xff]  }
  0x77   :  { %1194 = vmatprep.subr.bf16.mxu0 %v2311_v9  ;;  %2041 = vmatpush3.bf16.msra.mxu1 %v2313_v10  ;;  %v2390_v9 = vld [vmem:[#allocation5 + $0x188] ss:$12 sps:$4 sm:$0xff]   ;;  %v2386_v10 = vld [vmem:[#allocation5 + $0x480] ss:$12 sps:$4 sm:$0xff]  }
  0x78   :  { %1306 = vmatprep.mubr.bf16.mxu1 %v1851_v48  ;;  %2042 = vmatprep.subr.bf16.mxu1 %v2317_v11  ;;  %v2358_v48 = vld [vmem:[#allocation5 + $0x218] ss:$12 sps:$4 sm:$0xff]   ;;  %v2633_v11 = vcombine.low %v2622_v39, %v2622_v39  ;;  %v2417_v39 = vld [vmem:[#allocation7 + $0x58] sm:$0xff]  }
  0x79   :  { %1224 = vmatprep.mubr.bf16.mxu0 %v2626_v41 }
  0x7a   :  { %1195 = vmatpush1.bf16.msra.mxu0 %v2309_v12  ;;  %v2391_v12 = vld [vmem:[#allocation5 + $0x470] ss:$12 sps:$4 sm:$0xff]  }
  0x7b   :  { %1196 = vmatprep.subr.bf16.mxu0 %v2316_v13  ;;  %2043 = vmatpush3.bf16.msra.mxu1 %v2318_v14  ;;  %v2408_v13 = vld [vmem:[#allocation5 + $0x488] ss:$12 sps:$4 sm:$0xff]   ;;  %v2557_v14 = vmov 0.0  }
  0x7c   :  { %2044 = vmatprep.subr.bf16.mxu1 %v2322_v15  ;;  %v2558_v15 = vmov 0  }
  0x7e   :  { %1197 = vmatpush1.bf16.msra.mxu0 %v2314_v16  ;;  %v2392_v16 = vld [vmem:[#allocation2 + $0x18] ss:$0 sps:$4 sm:$0xff]  }
  0x7f   :  { %1198 = vmatprep.subr.bf16.mxu0 %v2321_v17  ;;  %2045 = vmatpush3.bf16.msra.mxu1 %v2323_v18  ;;  %v2393_v17 = vld [vmem:[#allocation5 + $0x3b0] ss:$12 sps:$4 sm:$0xff]   ;;  %v2394_v18 = vld [vmem:[#allocation5 + $0x458] ss:$12 sps:$4 sm:$0xff]  }
  0x80   :  { %2046 = vmatprep.subr.bf16.mxu1 %v2327_v19  ;;  %v2409_v19 = vld [vmem:[#allocation7 + $0x78] sm:$0xff]  }
  0x82   :  { %1199 = vmatpush1.bf16.msra.mxu0 %v2319_v20  ;;  %v2410_v20 = vld [vmem:[#allocation7 + $0x38] sm:$0xff]  }
  0x83   :  { %1200 = vmatprep.subr.bf16.mxu0 %v2326_v21  ;;  %2047 = vmatpush3.bf16.msra.mxu1 %v2328_v22  ;;  %v2395_v21 = vld [vmem:[#allocation5 + $0x398] ss:$12 sps:$4 sm:$0xff]   ;;  %v2411_v22 = vld [vmem:[#allocation7 + $0x70] sm:$0xff]  }
  0x84   :  { %2048 = vmatprep.subr.bf16.mxu1 %v2332_v23  ;;  %v2412_v23 = vld [vmem:[#allocation7 + $0x30] sm:$0xff]  }
  0x86   :  { %1201 = vmatpush1.bf16.msra.mxu0 %v2324_v24  ;;  %v2397_v24 = vld [vmem:[#allocation5 + $0x380] ss:$12 sps:$4 sm:$0xff]  }
  0x87   :  { %1202 = vmatprep.subr.bf16.mxu0 %v2331_v25  ;;  %2049 = vmatpush3.bf16.msra.mxu1 %v2333_v26  ;;  %v2413_v25 = vld [vmem:[#allocation7 + $0x68] sm:$0xff]   ;;  %v2398_v26 = vld [vmem:[#allocation5 + $0x428] ss:$12 sps:$4 sm:$0xff]  }
  0x88   :  { %2050 = vmatprep.subr.bf16.mxu1 %v2337_v27  ;;  %v2414_v27 = vld [vmem:[#allocation7 + $0x28] sm:$0xff]  }
  0x8a   :  { %1203 = vmatpush1.bf16.msra.mxu0 %v2329_v28  ;;  %v2399_v28 = vld [vmem:[#allocation5 + $0x368] ss:$12 sps:$4 sm:$0xff]  }
  0x8b   :  { %1204 = vmatprep.subr.bf16.mxu0 %v2336_v29  ;;  %2051 = vmatpush3.bf16.msra.mxu1 %v2338_v30  ;;  %v2400_v29 = vld [vmem:[#allocation5 + $0x410] ss:$12 sps:$4 sm:$0xff]  }
  0x8c   :  { %2052 = vmatprep.subr.bf16.mxu1 %v2342_v31  ;;  %v2401_v30 = vld [vmem:[#allocation5 + $0x350] ss:$12 sps:$4 sm:$0xff]   ;;  %v2402_v31 = vld [vmem:[#allocation5 + $0x3f8] ss:$12 sps:$4 sm:$0xff]  }
  0x8e   :  { %1205 = vmatpush1.bf16.msra.mxu0 %v2334_v32  ;;  %v2403_v32 = vld [vmem:[#allocation5 + $0x338] ss:$12 sps:$4 sm:$0xff]  }
  0x8f   :  { %1206 = vmatprep.subr.bf16.mxu0 %v2341_v33  ;;  %2053 = vmatpush3.bf16.msra.mxu1 %v2343_v34  ;;  %v2404_v33 = vld [vmem:[#allocation5 + $0x3e0] ss:$12 sps:$4 sm:$0xff]  }
  0x90   :  { %2054 = vmatprep.subr.bf16.mxu1 %v2347_v35  ;;  %v2405_v34 = vld [vmem:[#allocation5 + $0x320] ss:$12 sps:$4 sm:$0xff]   ;;  %v2406_v35 = vld [vmem:[#allocation5 + $0x3c8] ss:$12 sps:$4 sm:$0xff]  }
  0x92   :  { %1207 = vmatpush1.bf16.msra.mxu0 %v2339_v36  ;;  %v2407_v36 = vld [vmem:[#allocation5 + $0x308] ss:$12 sps:$4 sm:$0xff]  }
  0x93   :  { %1208 = vmatprep.subr.bf16.mxu0 %v2346_v37  ;;  %2055 = vmatpush3.bf16.msra.mxu1 %v2348_v38  ;;  %v2415_v37 = vld [vmem:[#allocation7 + $0x60] sm:$0xff]  }
  0x94   :  { %2062 = vmatprep.subr.bf16.mxu1 %v2352_v40  ;;  %v2416_v38 = vld [vmem:[#allocation7 + $0x20] sm:$0xff]   ;;  %v2418_v40 = vld [vmem:[#allocation7 + $0x18] sm:$0xff]  }
  0x96   :  { %1209 = vmatpush2.bf16.msra.mxu0 %v2344_v42  ;;  %1307 = vmatmul.mubr.bf16.vlgmr.msra.gmra.mxu1 %v2616_v5  ;;  %v2389_v5 = vld [vmem:[#allocation5 + $0x248] ss:$12 sps:$4 sm:$0xff]  }
  0x97   :  { %1210 = vmatprep.subr.bf16.mxu0 %v2351_v43  ;;  %2063 = vmatpush3.bf16.msra.mxu1 %v2353_v44  ;;  %v2420_v42 = vld [vmem:[#allocation7 + $0x10] sm:$0xff]   ;;  %v2421_v43 = vld [vmem:[#allocation7 + $0x48] sm:$0xff]  }
  0x98   :  { %1346 = vmatprep.mubr.bf16.mxu1 %v2613_v52  ;;  %2064 = vmatprep.subr.bf16.mxu1 %v2357_v45  ;;  %v2364_v52 = vld [vmem:[#allocation5 + $0x408] ss:$12 sps:$4 sm:$0xff]   ;;  %v2422_v44 = vld [vmem:[#allocation7 + $0x8] sm:$0xff]   ;;  %v2423_v45 = vld [vmem:[#allocation7 + $0x40] sm:$0xff]  }
  0x9a   :  { %1211 = vmatpush2.bf16.msra.mxu0 %v2349_v46  ;;  %v2424_v46 = vld [vmem:[#allocation7] sm:$0xff]  }
  0x9b   :  { %1212 = vmatprep.subr.bf16.mxu0 %v2356_v47  ;;  %2065 = vmatpush3.bf16.msra.mxu1 %v2358_v48  ;;  %v2425_v47 = vld [vmem:[#allocation7 + $0xb8] sm:$0xff]   ;;  %v2426_v48 = vld [vmem:[#allocation7 + $0xb0] sm:$0xff]  }
  0x9c   :  { %2066 = vmatprep.subr.bf16.mxu1 %v2362_v49  ;;  %v2427_v49 = vld [vmem:[#allocation7 + $0xa8] sm:$0xff]  }
  0x9e   :  { %1213 = vmatpush2.bf16.msra.mxu0 %v2354_v50  ;;  %v2428_v50 = vld [vmem:[#allocation7 + $0xa0] sm:$0xff]  }
  0x9f   :  { %1214 = vmatprep.subr.bf16.mxu0 %v2361_v51  ;;  %2067 = vmatpush3.bf16.msra.mxu1 %v2363_v53  ;;  %v2429_v51 = vld [vmem:[#allocation7 + $0x98] sm:$0xff]   ;;  %v2430_v53 = vld [vmem:[#allocation7 + $0x90] sm:$0xff]  }
  0xa0   :  { %2068 = vmatprep.subr.bf16.mxu1 %v2367_v54  ;;  %v2431_v54 = vld [vmem:[#allocation7 + $0x88] sm:$0xff]  }
  0xa2   :  { %1215 = vmatpush2.bf16.msra.mxu0 %v2359_v55  ;;  %v2432_v55 = vld [vmem:[#allocation7 + $0x80] sm:$0xff]  }
  0xa3   :  { %1216 = vmatprep.subr.bf16.mxu0 %v2366_v56  ;;  %2069 = vmatpush3.bf16.msra.mxu1 %v2368_v57  ;;  %v283_v56 = vlaneseq }
  0xa4   :  { %2070 = vmatprep.subr.bf16.mxu1 %v2372_v58 }
  0xa5   :  { %v284_v57 = vshrl.u32 %v283_v56, 7  ;;  %v2434_v56 = vld [vmem:[#allocation8 + $0x30] sm:$0xff]  }
  0xa6   :  { %1217 = vmatpush2.bf16.msra.mxu0 %v2364_v52  ;;  %v281_v52 = vld [vmem:[%s2678_s2] sm:$0x7] }
  0xa7   :  { %1218 = vmatprep.subr.bf16.mxu0 %v2371_v59  ;;  %2071 = vmatpush3.bf16.msra.mxu1 %v2373_v61  ;;  %v285_v58 = vsub.s32 0, %v284_v57  ;;  %v289_v59 = vsub.s32 1, %v284_v57 }
  0xa8   :  { %2072 = vmatprep.subr.bf16.mxu1 %v2377_v63 }
  0xa9   :  { %v290_v61 = vrot.slane %v281_v52, %v289_v59  ;;  %v2438_v59 = vld [vmem:[#allocation8 + $0x10] sm:$0xff]  }
  0xaa   :  { %1219 = vmatpush2.bf16.msra.mxu0 %v2369_v60  ;;  %v286_v60 = vrot.slane %v281_v52, %v285_v58  ;;  %v2436_v58 = vld [vmem:[#allocation8 + $0x20] sm:$0xff]  }
  0xab   :  { %1220 = vmatprep.subr.bf16.mxu0 %v2376_v62  ;;  %2073 = vmatpush3.bf16.msra.mxu1 %v2378_v0 }
  0xac   :  { %2074 = vmatprep.subr.bf16.mxu1 %v2382_v1 }
  0xae   :  { %1221 = vmatpush2.bf16.msra.mxu0 %v2374_v2 }
  0xaf   :  { %1222 = vmatprep.subr.bf16.mxu0 %v2381_v3  ;;  %2075 = vmatpush3.bf16.msra.mxu1 %v2385_v4 }
  0xb0   :  { %2076 = vmatprep.subr.bf16.mxu1 %v2389_v5 }
  0xb2   :  { %1223 = vmatpush2.bf16.msra.mxu0 %v2379_v6 }
  0xb3   :  { %1247 = vmatprep.subr.bf16.mxu0 %v2388_v7  ;;  %2077 = vmatpush3.bf16.msra.mxu1 %v2390_v9 }
  0xb4   :  { %2148 = vmatprep.subr.bf16.mxu1 %v2557_v14 }
  0xb5   :  { %1225 = vmatmul.mubr.bf16.vlgmr.msra.gmra.mxu0 %v2633_v11 }
  0xb6   :  { %1248 = vmatpush1.bf16.msra.mxu0 %v2386_v10  ;;  %1265 = vmatprep.mubr.bf16.mxu0 %v2558_v15 }
  0xb7   :  { %1347 = vmatmul.mubr.bf16.vlgmr.msra.gmra.mxu1 %v2618_v8  ;;  %2084 = vmatprep.subr.bf16.mxu0 %v2391_v12  ;;  %v2396_v8 = vld [vmem:[#allocation5 + $0x440] ss:$12 sps:$4 sm:$0xff]  }
  0xb8   :  { %2149 = vmatpush3.bf16.msra.mxu1 %v2408_v13  ;;  %2150 = vmatprep.mubr.msk.bf16.mxu1 %vm2559_vm1, %v2557_v14 }
  0xb9   :  { %2108 = vmatprep.subr.bf16.mxu1 %v2409_v19 }
  0xbd   :  { %2004 = vmatmul.mubr.msk.bf16.vlgmr.msra.gmra.mxu0 %vm1106_vm0, %v2392_v16 }
  0xbe   :  { %2085 = vmatpush3.bf16.msra.mxu0 %v2393_v17  ;;  %1386 = vmatprep.mubr.bf16.mxu0 %v2626_v41  ;;  %v2419_v41 = vld [vmem:[#allocation7 + $0x50] sm:$0xff]  }
  0xbf   :  { %2086 = vmatprep.subr.bf16.mxu0 %v2394_v18  ;;  %2151 = vmatmul.mubr.msk.bf16.vlgmr.msra.gmra.mxu1 %vm1106_vm0, %v2392_v16 }
  0xc0   :  { %2109 = vmatpush3.bf16.msra.mxu1 %v2410_v20 }
  0xc1   :  { %2110 = vmatprep.subr.bf16.mxu1 %v2411_v22 }
  0xc2   :  { %2087 = vmatpush3.bf16.msra.mxu0 %v2395_v21 }
  0xc3   :  { %2088 = vmatprep.subr.bf16.mxu0 %v2396_v8 }
  0xc4   :  { %2111 = vmatpush3.bf16.msra.mxu1 %v2412_v23 }
  0xc5   :  { %2112 = vmatprep.subr.bf16.mxu1 %v2413_v25 }
  0xc6   :  { %2089 = vmatpush3.bf16.msra.mxu0 %v2397_v24 }
  0xc7   :  { %2090 = vmatprep.subr.bf16.mxu0 %v2398_v26 }
  0xc8   :  { %2113 = vmatpush3.bf16.msra.mxu1 %v2414_v27 }
  0xc9   :  { %2114 = vmatprep.subr.bf16.mxu1 %v2415_v37 }
  0xca   :  { %2091 = vmatpush3.bf16.msra.mxu0 %v2399_v28 }
  0xcb   :  { %2092 = vmatprep.subr.bf16.mxu0 %v2400_v29 }
  0xcc   :  { %2115 = vmatpush3.bf16.msra.mxu1 %v2416_v38 }
  0xcd   :  { %2116 = vmatprep.subr.bf16.mxu1 %v2417_v39 }
  0xce   :  { %2093 = vmatpush3.bf16.msra.mxu0 %v2401_v30 }
  0xcf   :  { %2094 = vmatprep.subr.bf16.mxu0 %v2402_v31 }
  0xd0   :  { %2117 = vmatpush3.bf16.msra.mxu1 %v2418_v40  ;;  %v293_v40 = vsub.s32 2, %v284_v57  ;;  %v2435_v57 = vld [vmem:[#allocation8 + $0x28] sm:$0xff]  }
  0xd1   :  { %2118 = vmatprep.subr.bf16.mxu1 %v2419_v41 }
  0xd2   :  { %2095 = vmatpush3.bf16.msra.mxu0 %v2403_v32  ;;  %v294_v41 = vrot.slane %v281_v52, %v293_v40  ;;  %v2437_v52 = vld [vmem:[#allocation8 + $0x18] sm:$0xff]  }
  0xd3   :  { %2096 = vmatprep.subr.bf16.mxu0 %v2404_v33 }
  0xd4   :  { %2119 = vmatpush3.bf16.msra.mxu1 %v2420_v42 }
  0xd5   :  { %2120 = vmatprep.subr.bf16.mxu1 %v2421_v43 }
  0xd6   :  { %2097 = vmatpush3.bf16.msra.mxu0 %v2405_v34 }
  0xd7   :  { %2098 = vmatprep.subr.bf16.mxu0 %v2406_v35 }
  0xd8   :  { %2121 = vmatpush3.bf16.msra.mxu1 %v2422_v44 }
  0xd9   :  { %2122 = vmatprep.subr.bf16.mxu1 %v2423_v45 }
  0xda   :  { %2099 = vmatpush3.bf16.msra.mxu0 %v2407_v36 }
  0xdb   :  { %2154 = vmatprep.subr.bf16.mxu0 %v2557_v14 }
  0xdc   :  { %2123 = vmatpush3.bf16.msra.mxu1 %v2424_v46 }
  0xdd   :  { %1387 = vmatmul.mubr.bf16.vlgmr.msra.gmra.mxu0 %v2633_v11  ;;  %2174 = vmatprep.subr.bf16.mxu1 %v2557_v14 }
  0xde   :  { %2170 = vmatprep.mubr.msk.bf16.mxu0 %vm2559_vm1, %v2557_v14  ;;  %2155 = vmatpush3.bf16.msra.mxu0 %v2425_v47 }
  0xdf   :  { %2156 = vmatprep.subr.bf16.mxu0 %v2557_v14 }
  0xe2   :  { %2157 = vmatpush3.bf16.msra.mxu0 %v2426_v48 }
  0xe3   :  { %2158 = vmatprep.subr.bf16.mxu0 %v2557_v14 }
  0xe6   :  { %2159 = vmatpush3.bf16.msra.mxu0 %v2427_v49 }
  0xe7   :  { %2160 = vmatprep.subr.bf16.mxu0 %v2557_v14 }
  0xea   :  { %2161 = vmatpush3.bf16.msra.mxu0 %v2428_v50 }
  0xeb   :  { %2162 = vmatprep.subr.bf16.mxu0 %v2557_v14 }
  0xee   :  { %2163 = vmatpush3.bf16.msra.mxu0 %v2429_v51 }
  0xef   :  { %2164 = vmatprep.subr.bf16.mxu0 %v2557_v14 }
  0xf2   :  { %2165 = vmatpush3.bf16.msra.mxu0 %v2430_v53 }
  0xf3   :  { %2166 = vmatprep.subr.bf16.mxu0 %v2557_v14 }
  0xf6   :  { %2167 = vmatpush3.bf16.msra.mxu0 %v2431_v54 }
  0xf7   :  { %2168 = vmatprep.subr.bf16.mxu0 %v2557_v14 }
  0xfa   :  { %2169 = vmatpush3.bf16.msra.mxu0 %v2432_v55  ;;  %v2433_v55 = vld [vmem:[#allocation8 + $0x38] sm:$0xff]  }
 0x135   :  { %v1144_v62 = vpop.f32.mrf.mxu0 }
 0x136   :  { %v1145_v63 = vadd.f32 %v1144_v62, %v286_v60  ;;  %v1185_v1 = vpop.f32.mrf.mxu1  ;;  %v2439_v60 = vld [vmem:[#allocation8 + $0x8] sm:$0xff]  }
 0x137   :  { %v1146_v0 = vpop.f32.mrf.mxu0 }
 0x138   :  { %v1147_v2 = vadd.f32 %v1146_v0, %v290_v61  ;;  %v1186_v3 = vadd.f32 %v1185_v1, %v1145_v63  ;;  %v1187_v5 = vpop.f32.mrf.mxu1  ;;  %v2440_v61 = vld [vmem:[#allocation8] sm:$0xff]  }
 0x139   :  { %v1148_v4 = vpop.f32.mrf.mxu0 }
 0x13a   :  { %v1188_v6 = vadd.f32 %v1187_v5, %v1147_v2  ;;  %v1189_v9 = vpop.f32.mrf.mxu1 }
 0x13b   :  { %v1149_v7 = vpop.f32.mrf.mxu0 }
 0x13c   :  { %v1190_v10 = vpop.f32.mrf.mxu1 }
 0x156   :  { %v2056_v11 = vpop.f32.mrf.mxu1 }
 0x158   :  { %v2057_v12 = vpop.f32.mrf.mxu1 }
 0x159   :  { %v2058_v13 = vadd.f32 %v2057_v12, %v2056_v11 }
 0x15a   :  { %v2059_v15 = vpop.f32.mrf.mxu1 }
 0x15b   :  { %v1309_v42 = vadd.f32 %v2058_v13, %v294_v41 }
 0x15c   :  { %v2060_v16 = vpop.f32.mrf.mxu1 }
 0x175   :  { %v1226_v17 = vpop.f32.mrf.mxu0 }
 0x176   :  { %v1227_v23 = vadd.f32 %v1226_v17, %v1186_v3  ;;  %v2006_v3 = vld [vmem:[%s2680_s4] ss:$0 sm:$0xff]  ;;  %s2521_s4 = scalar_lea.vmem %s1840_s27, 128 }
 0x177   :  { %v1228_v18 = vpop.f32.mrf.mxu0  ;;  %v2078_v19 = vpop.f32.mrf.mxu1  ;;  %p2522_p6 = scmp.ne.s32.totalorder %s1840_s27, %s2521_s4  ;;  %p2527_p8 = scmp.lt.s32.totalorder %s2521_s4, %s2521_s4 }
 0x178   :  { %v1229_v26 = vadd.f32 %v1228_v18, %v1188_v6 }
 0x179   :  { %v1230_v20 = vpop.f32.mrf.mxu0  ;;  %v2079_v21 = vpop.f32.mrf.mxu1  ;;  %p2528_p9 = por %p2527_p8, %p2526_p7 }
 0x17a   :  { %v2080_v43 = vadd.f32 %v2079_v21, %v2078_v19 }
 0x17b   :  { %v1231_v22 = vpop.f32.mrf.mxu0  ;;  %v2081_v8 = vpop.f32.mrf.mxu1  ;;  %p2529_p10 = pnand %p2528_p9, %p2522_p6 }
 0x17c   :  { %v1349_v46 = vadd.f32 %v2080_v43, %v1309_v42 }
 0x17d   :  { %v1267_v24 = vpop.f32.mrf.mxu0  ;;  %v2082_v25 = vpop.f32.mrf.mxu1 }
 0x17e   :  { %v1268_v27 = vadd.f32 %v1267_v24, %v1227_v23 }
 0x17f   :  { %v1269_v28 = vpop.f32.mrf.mxu0  ;;  %v1428_v29 = vpop.f32.mrf.mxu1 }
 0x180   :  { %v1270_v30 = vadd.f32 %v1269_v28, %v1229_v26  ;;  %v1434_v31 = vmax.f32 %v1268_v27, 0.0 }
 0x181   :  { %v1271_v32 = vpop.f32.mrf.mxu0  ;;  %v2152_v33 = vpop.f32.mrf.mxu1 }
 0x182   :  { %v1435_v34 = vmax.f32 %v1270_v30, 0.0  ;;  %v1437_v38 = vpack.c.bf16 %v1434_v31, %v1434_v31 }
 0x183   :  { %v1272_v35 = vpop.f32.mrf.mxu0  ;;  %v1431_v36 = vpop.f32.mrf.mxu1 }
 0x184   :  { %v1438_v37 = vpack.c.bf16 %v1435_v34, %v1435_v34 }
 0x185   :  { %v2153_v39 = vpop.f32.mrf.mxu1 }
 0x186   :  { %1671 = vmatprep.mubr.bf16.mxu1 %v1438_v37 }
 0x187   :  { %1672 = vmatmul.mubr.bf16.vlgmr.msra.gmra.mxu1 %v1437_v38 }
 0x188   :  { %2190 = vmatprep.mubr.msk.bf16.mxu1 %vm2559_vm1, %v2557_v14  ;;  %2175 = vmatpush3.bf16.msra.mxu1 %v2433_v55 }
 0x189   :  { %2176 = vmatprep.subr.bf16.mxu1 %v2557_v14 }
 0x18c   :  { %2177 = vmatpush3.bf16.msra.mxu1 %v2434_v56 }
 0x18d   :  { %2178 = vmatprep.subr.bf16.mxu1 %v2557_v14 }
 0x190   :  { %2179 = vmatpush3.bf16.msra.mxu1 %v2435_v57 }
 0x191   :  { %2180 = vmatprep.subr.bf16.mxu1 %v2557_v14 }
 0x194   :  { %2181 = vmatpush3.bf16.msra.mxu1 %v2436_v58 }
 0x195   :  { %2182 = vmatprep.subr.bf16.mxu1 %v2557_v14 }
 0x198   :  { %2183 = vmatpush3.bf16.msra.mxu1 %v2437_v52 }
 0x199   :  { %2184 = vmatprep.subr.bf16.mxu1 %v2557_v14 }
 0x19c   :  { %2185 = vmatpush3.bf16.msra.mxu1 %v2438_v59 }
 0x19d   :  { %v2100_v44 = vpop.f32.mrf.mxu0  ;;  %2186 = vmatprep.subr.bf16.mxu1 %v2557_v14 }
 0x19f   :  { %v2101_v45 = vpop.f32.mrf.mxu0 }
 0x1a0   :  { %v2102_v47 = vadd.f32 %v2101_v45, %v2100_v44  ;;  %2187 = vmatpush3.bf16.msra.mxu1 %v2439_v60 }
 0x1a1   :  { %v2103_v48 = vpop.f32.mrf.mxu0  ;;  %2188 = vmatprep.subr.bf16.mxu1 %v2557_v14  ;;  %v2031_v14 = vld [vmem:[%s2682_s6] ss:$0 sm:$0xff] }
 0x1a2   :  { %v1389_v49 = vadd.f32 %v2102_v47, %v1349_v46 }
 0x1a3   :  { %v2104_v50 = vpop.f32.mrf.mxu0 }
 0x1a4   :  { %v1429_v51 = vadd.f32 %v1428_v29, %v1389_v49  ;;  %2189 = vmatpush3.bf16.msra.mxu1 %v2440_v61 }
 0x1a6   :  { %v1436_v53 = vmax.f32 %v1429_v51, 0.0 }
 0x1a8   :  { %v1439_v54 = vpack.c.bf16 %v1436_v53, %v1436_v53 }
 0x1aa   :  { %2171 = vmatmul.mubr.bf16.vlgmr.msra.gmra.mxu0 %v1439_v54 }
 0x247   :  { %v2124_v62 = vpop.f32.mrf.mxu1 }
 0x249   :  { %v2125_v63 = vpop.f32.mrf.mxu1 }
 0x24a   :  { %v2126_v2 = vadd.f32 %v2125_v63, %v2124_v62 }
 0x24b   :  { %v2127_v0 = vpop.f32.mrf.mxu1 }
 0x24c   :  { %v1674_v4 = vadd.f32 %v2126_v2, %v2006_v3 }
 0x24d   :  { %v2128_v1 = vpop.f32.mrf.mxu1 }
 0x26a   :  { %v1713_v5 = vpop.f32.mrf.mxu0 }
 0x26b   :  { %v1714_v6 = vadd.f32 %v1713_v5, %v1674_v4 }
 0x26c   :  { %v2172_v7 = vpop.f32.mrf.mxu0 }
 0x26d   :  { %v1719_v9 = vmax.f32 %v1714_v6, 0.0 }
 0x26e   :  { %v1716_v10 = vpop.f32.mrf.mxu0 }
 0x26f   :  { %v1720_v11 = vpack.c.bf16 %v1719_v9, %v1719_v9 }
 0x270   :  { %v2173_v12 = vpop.f32.mrf.mxu0 }
 0x271   :  { %2191 = vmatmul.mubr.bf16.vlgmr.msra.gmra.mxu1 %v1720_v11 }
 0x331   :  { %v1826_v13 = vpop.f32.mrf.mxu1 }
 0x332   :  { %v1827_v15 = vadd.f32 %v2031_v14, %v1826_v13 }
 0x333   :  { %v2192_v16 = vpop.f32.mrf.mxu1 }
 0x334   :  { %1832 = vst [vmem:[#allocation10] sm:$0xff] %v1827_v15 }
 0x335   :  { %v1829_v17 = vpop.f32.mrf.mxu1 }
 0x336   :  { %2532 = shalt.err (!%p2529_p10)
}
 0x337   :  { %1842 = dma.vmem_to_hbm [thread:$0]  %s1840_s27, 128, %s2683_s7, [#allocation4]   ;;  %v2193_v18 = vpop.f32.mrf.mxu1 }
 0x338   :  { %2547 = dma.done.wait [#allocation4], 128  }
 0x339   :  { %2548 = vsyncadd [#allocation4], 4294967168 }
 0x33a   :  { %1846 = vsyncpa [#allocation3], 1 }
 0x33b   :  { %1847 = vsyncpa [#allocation6], 1 }
 0x33c   :  { %1848 = vsyncpa [#allocation9], 1 }
 0x33d   :  { %1849 = vsyncpa [#allocation4], 1 }

</bundles_post_ra>
